<compile_context>
chip_gen: v5e
topology: v5e:2x2
jax: 0.10.0
libtpu: 0.0.40
codegen_flags: <defaults>
</compile_context>

<pallas_src>
import jax
import jax.numpy as jnp
from jax.experimental import pallas as pl
from jax.experimental.pallas import tpu as pltpu


def _waveblock_kernel(params_ref, x_ref, o_ref):
    # params_ref: SMEM int32[2] = (lo, hi) — flat-column band bounds.
    # x_ref / o_ref block: (B, CT) slice of the (N*C, H*W) lane-dense slab.
    lo = params_ref[0]
    hi = params_ref[1]

    ct = x_ref.shape[1]
    col0 = pl.program_id(1) * ct                     # global column offset
    col = col0 + jax.lax.broadcasted_iota(jnp.int32, (1, ct), dimension=1)
    inside = (col >= lo) & (col < hi)

    dt = x_ref.dtype
    mask = jnp.where(inside, jnp.array(1.0, dt), jnp.array(1.5, dt))  # (1, CT)
    o_ref[...] = x_ref[...] * mask                   # broadcasts over B rows


def waveblock(x, sx, rh, training=True, *,
              target_block_bytes=8 * 1024 * 1024, donate=False):
    """x: (N, C, H, W) floating point. sx, rh: band start / height along H."""
    if not training:
        return x
    if not jnp.issubdtype(x.dtype, jnp.floating):
        # PyTorch's 1.5 mask only makes sense for floating inputs.
        raise TypeError("waveblock expects a floating-point input dtype")

    n, c, h, w = x.shape
    rows = n * c
    hw = h * w
    x2 = x.reshape(rows, hw)                          # lane-dense 2D slab

    itemsize = jnp.dtype(x.dtype).itemsize
    smult = max(8, 32 // itemsize)                    # 8 f32, 16 bf16, 32 fp8
    bytes_per_row = hw * itemsize
    min_row_block = min(rows, smult)                  # full extent if tiny

    # ---- block-size selection -------------------------------------------
    if min_row_block * bytes_per_row <= target_block_bytes or hw % 128 != 0:
        # Row blocking with the full H*W plane as the (lane-dense) last dim.
        # (If hw is not a 128-multiple we must keep the full extent anyway.)
        ct = hw
        b = max(1, target_block_bytes // bytes_per_row)
        if b >= rows:
            # Whole tensor fits in one block: split rows so a v7x chip can
            # shard the grid across both TensorCores.
            if rows >= 2 * smult:
                b = ((rows // 2) // smult) * smult
            else:
                b = rows                              # full extent (legal)
        else:
            b = max(min_row_block, (b // smult) * smult)
            b = min(b, rows)
        # TODO(synk): if hw % 128 != 0 AND a single row exceeds the budget,
        # the block may exceed target_block_bytes; raised vmem_limit covers
        # typical CNN feature-map sizes.
    else:
        # A single row (times the minimum sublane block) is too big: tile the
        # flattened H*W axis with a 128-multiple column tile.
        b = min_row_block
        ct = (target_block_bytes // (b * itemsize)) // 128 * 128
        ct = max(128, min(ct, hw))

    grid = (pl.cdiv(rows, b), pl.cdiv(hw, ct))

    # Band bounds as flat column offsets (scalar math done on host).
    params = jnp.array([sx * w, (sx + rh) * w], dtype=jnp.int32)

    kwargs = {}
    if donate:
        # Flat inputs are (params, x2) -> x2 is input index 1.
        kwargs["input_output_aliases"] = {1: 0}

    out = pl.pallas_call(
        _waveblock_kernel,
        out_shape=jax.ShapeDtypeStruct((rows, hw), x.dtype),
        grid_spec=pltpu.PrefetchScalarGridSpec(
            num_scalar_prefetch=1,
            grid=grid,
            in_specs=[pl.BlockSpec((b, ct), lambda i, j, p: (i, j))],
            out_specs=pl.BlockSpec((b, ct), lambda i, j, p: (i, j)),
        ),
        compiler_params=pltpu.CompilerParams(
            dimension_semantics=("parallel", "parallel"),
            # <= 8 MiB blocks, double-buffered in+out => <= 32 MiB; 48 MiB
            # scoped limit leaves headroom and fits v7x's 64 MiB physical VMEM.
            vmem_limit_bytes=48 * 1024 * 1024,
        ),
        cost_estimate=pl.CostEstimate(
            flops=rows * hw,
            transcendentals=0,
            bytes_accessed=2 * rows * hw * itemsize,
        ),
        **kwargs,
    )(params, x2)
    return out.reshape(n, c, h, w)


if __name__ == "__main__":
    import random

    # deterministic inputs
    key = jax.random.PRNGKey(0)
    N, C, H, W = 2, 4, 16, 16
    x = jax.random.normal(key, (N, C, H, W), dtype=jnp.float32)

    # deterministic "random" band, mirroring the PyTorch module's logic
    random.seed(0)
    rh = round(0.3 * H)
    sx = random.randint(0, H - rh)

    y = waveblock(x, sx, rh, training=True)
    y = jax.block_until_ready(y)

    # reference check in plain JAX
    mask = jnp.full((N, C, H, W), 1.5, dtype=x.dtype)
    mask = mask.at[:, :, sx:sx + rh, :].set(1.0)
    ref = x * mask
    assert jnp.allclose(y, ref), "mismatch vs reference"

    # eval mode is identity
    assert jnp.allclose(waveblock(x, sx, rh, training=False), x)

    print("KERNEL_OK")
</pallas_src>

<mosaic_0001>
module attributes {stable_mosaic.version = 11 : i64} {
  func.func @_waveblock_kernel(%arg0: i32, %arg1: i32, %arg2: memref<2xi32, #tpu.memory_space<smem>>, %arg3: memref<8x256xf32, #tpu.memory_space<vmem>>, %arg4: memref<8x256xf32, #tpu.memory_space<vmem>>) attributes {dimension_semantics = [#tpu.dimension_semantics<parallel>, #tpu.dimension_semantics<parallel>], iteration_bounds = array<i64: 1, 1>, scalar_prefetch = 1 : i64, scratch_operands = 0 : i64, tpu.core_type = #tpu.core_type<tc>, window_params = [{transform_indices = @transform_0, window_bounds = array<i64: 8, 256>}, {transform_indices = @transform_1, window_bounds = array<i64: 8, 256>}]} {
    %c0 = arith.constant 0 : index
    %0 = memref.load %arg2[%c0] : memref<2xi32, #tpu.memory_space<smem>>
    %c1 = arith.constant 1 : index
    %1 = memref.load %arg2[%c1] : memref<2xi32, #tpu.memory_space<smem>>
    %c256_i32 = arith.constant 256 : i32
    %2 = arith.muli %arg1, %c256_i32 : i32
    %3 = tpu.iota {dimensions = array<i32: 1>} : vector<1x256xi32>
    %4 = vector.broadcast %2 : i32 to vector<1x256xi32>
    %5 = arith.addi %4, %3 : vector<1x256xi32>
    %6 = vector.broadcast %0 : i32 to vector<1x256xi32>
    %7 = arith.cmpi sge, %5, %6 : vector<1x256xi32>
    %8 = vector.broadcast %1 : i32 to vector<1x256xi32>
    %9 = arith.cmpi slt, %5, %8 : vector<1x256xi32>
    %10 = arith.andi %7, %9 : vector<1x256xi1>
    %cst = arith.constant 1.000000e+00 : f32
    %cst_0 = arith.constant 1.500000e+00 : f32
    %11 = vector.broadcast %cst : f32 to vector<1x256xf32>
    %12 = vector.broadcast %cst_0 : f32 to vector<1x256xf32>
    %13 = arith.select %10, %11, %12 : vector<1x256xi1>, vector<1x256xf32>
    %c0_1 = arith.constant 0 : index
    %c0_2 = arith.constant 0 : index
    %14 = vector.load %arg3[%c0_1, %c0_2] : memref<8x256xf32, #tpu.memory_space<vmem>>, vector<8x256xf32>
    %15 = vector.broadcast %13 : vector<1x256xf32> to vector<8x256xf32>
    %16 = arith.mulf %14, %15 : vector<8x256xf32>
    %c0_3 = arith.constant 0 : index
    %c0_4 = arith.constant 0 : index
    %17 = vector.load %arg4[%c0_3, %c0_4] : memref<8x256xf32, #tpu.memory_space<vmem>>, vector<8x256xf32>
    tpu.vector_store %arg4[%c0_3, %c0_4], %16 {strides = array<i32>} : memref<8x256xf32, #tpu.memory_space<vmem>>, vector<8x256xf32>,
    return
  }
  func.func @transform_0(%arg0: i32, %arg1: i32, %arg2: memref<2xi32, #tpu.memory_space<smem>>) -> (i32, i32) {
    %c0_i32 = arith.constant 0 : i32
    return %arg0, %arg1 : i32, i32
  }
  func.func @transform_1(%arg0: i32, %arg1: i32, %arg2: memref<2xi32, #tpu.memory_space<smem>>) -> (i32, i32) {
    %c0_i32 = arith.constant 0 : i32
    return %arg0, %arg1 : i32, i32
  }
}

</mosaic_0001>

<bundles_post_ra>
// kernel: tpu_custom_call.1
= control target key start
LH: loop header
LB: loop body
LE: loop exit
PB: predicated region body
PF: predicated region fallthrough
CT: control target
= control target key end

     0   :  { %s145_s12 = smov [#allocation3]   ;;  %s173_s0 = inlined_call_operand.hbm [shape: s32[2], index: 0, kind: input, shape index: {}]   ;;  %s174_s1 = inlined_call_operand.hbm [shape: f32[8,256], index: 1, kind: input, shape index: {}]   ;;  %s175_s2 = inlined_call_operand.hbm [shape: f32[8,256], index: 2, kind: output, shape index: {}]  }
   0x1   :  { %s8_s11 = sshll.u32 %s173_s0, 4  ;;  %s9_s11 = int_to_ptr.hbm [resolvable:$true] %s8_s11 }
   0x2   :  { %11 = dma.hbm_to_smem %s9_s11, 16, %s145_s12, [#allocation2] }
   0x3   :  { %139 = dma.done.wait [#allocation2], 16 }
   0x4   :  { %140 = vsyncadd [#allocation2], 4294967280 }
   0x5   :  { %14 = sfence }
   0x6   :  { %15 = vsyncpa [#allocation5], 0 }
   0x7   :  { %16 = vsyncpa [#allocation6], 0  ;;  %s22_s15 = sshll.u32 %s174_s1, 4  ;;  %s146_s16 = smov [#allocation4]   ;;  %s23_s15 = int_to_ptr.hbm [resolvable:$true] %s22_s15 }
   0x8   :  { %s24_s17 = sshll.u32 %s146_s16, 4  ;;  %s25_s17 = int_to_ptr.vmem [resolvable:$true] %s24_s17 }
   0x9   :  { %27 = dma.hbm_to_vmem [thread:$0]  %s23_s15, 256, %s25_s17, [#allocation5]  }
   0xa   :  { %141 = dma.done.wait [#allocation5], 256  }
   0xb   :  { %142 = vsyncadd [#allocation5], 4294967040  ;;  %v35_v0 = vlaneseq  ;;  %s32_s0 = sld [smem:[#allocation3]]  ;;  %v51_v5 = vld [vmem:[#allocation4] sm:$0xff]  ;;  %v52_v6 = vld [vmem:[#allocation4 + $0x8] sm:$0xff]  ;;  %s147_s1 = smov [#allocation7]  }
   0xc   :  { %s74_s18 = sld [smem:[#allocation3 + $0x1]]  ;;  %s62_s19 = sshll.u32 %s147_s1, 4  ;;  %v148_v7 = vmov 1.5   ;;  %s63_s19 = int_to_ptr.vmem [resolvable:$true] %s62_s19 }
   0xd   :  { %v36_v1 = vand.u32 127, %v35_v0  ;;  %s64_s22 = sshll.u32 %s175_s2, 4  ;;  %s65_s22 = int_to_ptr.hbm [resolvable:$true] %s64_s22 }
   0xf   :  { %v37_v2 = vadd.s32 128, %v36_v1 }
  0x11   :  { %v41_v3 = vstv %s32_s0 }
  0x12   :  { %vm42_vm0 = vcmp.ge.s32.totalorder %v36_v1, %v41_v3  ;;  %v44_v4 = vstv %s74_s18  ;;  %vm43_vm1 = vcmp.ge.s32.totalorder %v37_v2, %v41_v3 }
  0x13   :  { %vm45_vm2 = vcmp.lt.s32.totalorder %v36_v1, %v44_v4  ;;  %vm46_vm3 = vcmp.lt.s32.totalorder %v37_v2, %v44_v4 }
  0x14   :  { %vm47_vm4 = vmand %vm42_vm0, %vm45_vm2 }
  0x15   :  { %v49_v8 = vsel %vm47_vm4, 1.0, %v148_v7  ;;  %vm48_vm5 = vmand %vm43_vm1, %vm46_vm3 }
  0x16   :  { %v53_v9 = vmul.f32 %v51_v5, %v49_v8  ;;  %v50_v10 = vsel %vm48_vm5, 1.0, %v148_v7 }
  0x17   :  { %v54_v11 = vmul.f32 %v52_v6, %v50_v10 }
  0x18   :  { %55 = vst [vmem:[#allocation7] sm:$0xff] %v53_v9 }
  0x19   :  { %56 = vst [vmem:[#allocation7 + $0x8] sm:$0xff] %v54_v11 }
  0x1a   :  { %67 = dma.vmem_to_hbm [thread:$0]  %s63_s19, 256, %s65_s22, [#allocation6]  }
  0x1b   :  { %143 = dma.done.wait [#allocation6], 256  }
  0x1c   :  { %144 = vsyncadd [#allocation6], 4294967040 }
  0x1d   :  { %72 = vsyncpa [#allocation5], 1 }
  0x1e   :  { %73 = vsyncpa [#allocation6], 1 }

</bundles_post_ra>
